<compile_context>
chip_gen: v6e
topology: v6e:2x2x1
jax: 0.10.0
libtpu: 0.0.40
codegen_flags: <defaults>
</compile_context>

<pallas_src>
import jax
import jax.numpy as jnp
from jax.experimental import pallas as pl
from jax.experimental.pallas import tpu as pltpu

LANES = 128
SUBLANES = 8
MAX_BLOCK_ROWS = 4096  # 4096*128*4B = 2 MiB per f32 input block


def _make_dice_kernel(n_elem, block_rows, k_steps, needs_mask):
    """Builds the kernel with shape constants baked in at trace time."""

    def kernel(pr_ref, gt_ref, acc_ref):
        k = pl.program_id(1)

        # Zero this core's accumulator tile on its first reduction step.
        @pl.when(k == 0)
        def _():
            acc_ref[...] = jnp.zeros_like(acc_ref)

        # In-kernel cast keeps HBM traffic at the native input width.
        pr = jax.nn.sigmoid(pr_ref[...].astype(jnp.float32))
        gt = gt_ref[...].astype(jnp.float32)

        if needs_mask:
            # Mask the ragged tail (lane padding and/or partial last block).
            blk = pl.program_id(0) * k_steps + k
            row = jax.lax.broadcasted_iota(jnp.int32, (block_rows, LANES), 0)
            lane = jax.lax.broadcasted_iota(jnp.int32, (block_rows, LANES), 1)
            grow = blk * block_rows + row
            full_rows = n_elem // LANES
            rem = n_elem % LANES
            if rem == 0:
                valid = grow < full_rows
            else:
                valid = (grow < full_rows) | ((grow == full_rows) & (lane < rem))
            pr = jnp.where(valid, pr, 0.0)
            gt = jnp.where(valid, gt, 0.0)

        tp = gt * pr
        shape3 = (block_rows // SUBLANES, SUBLANES, LANES)
        # Leading-axis reductions = pure VPU vreg adds; lane/sublane structure
        # is preserved so the expensive cross-lane reduce happens only once,
        # outside the kernel.
        acc_ref[0] += tp.reshape(shape3).sum(axis=0)
        acc_ref[1] += pr.reshape(shape3).sum(axis=0)
        acc_ref[2] += gt.reshape(shape3).sum(axis=0)

    return kernel


def dice_loss(y_pr, y_gt, *, eps=1e-07, beta=1.0):
    """1 - f_score(y_pr, y_gt, beta, eps, threshold=None, activation='sigmoid').

    y_pr, y_gt: same-shape arrays (any float dtype, e.g. NCHW); returns scalar f32.
    """
    assert y_pr.shape == y_gt.shape
    n_elem = y_pr.size

    pr_flat = y_pr.reshape(-1)
    gt_flat = y_gt.reshape(-1)

    # Pad only to the minimal (8*128)-element granule needed to reshape into a
    # lane-aligned (rows, 128) slab.  Pad values are irrelevant: the kernel
    # masks everything past n_elem.
    granule = SUBLANES * LANES
    padded = pl.cdiv(n_elem, granule) * granule
    if padded != n_elem:
        pr_flat = jnp.pad(pr_flat, (0, padded - n_elem))
        gt_flat = jnp.pad(gt_flat, (0, padded - n_elem))

    rows = padded // LANES
    pr2d = pr_flat.reshape(rows, LANES)
    gt2d = gt_flat.reshape(rows, LANES)

    block_rows = min(MAX_BLOCK_ROWS, rows)          # multiple of 8 by construction
    blocks_total = pl.cdiv(rows, block_rows)

    # Split row-blocks across the two v7x TensorCores when it divides evenly;
    # otherwise fall back to a single sequential reduction axis.
    nsplit = 2 if (blocks_total >= 2 and blocks_total % 2 == 0) else 1
    k_steps = blocks_total // nsplit

    needs_mask = (blocks_total * block_rows * LANES) != n_elem

    kernel = _make_dice_kernel(n_elem, block_rows, k_steps, needs_mask)

    partials = pl.pallas_call(
        kernel,
        out_shape=jax.ShapeDtypeStruct((nsplit * 3, SUBLANES, LANES), jnp.float32),
        grid_spec=pltpu.PrefetchScalarGridSpec(
            num_scalar_prefetch=0,
            grid=(nsplit, k_steps),
            in_specs=[
                pl.BlockSpec((block_rows, LANES), lambda j, k: (j * k_steps + k, 0)),
                pl.BlockSpec((block_rows, LANES), lambda j, k: (j * k_steps + k, 0)),
            ],
            # Per-core resident accumulator tile: 3 x (8,128) f32, revisited
            # across the "arbitrary" reduction axis, distinct per parallel j.
            out_specs=pl.BlockSpec((3, SUBLANES, LANES), lambda j, k: (j, 0, 0)),
        ),
        compiler_params=pltpu.CompilerParams(
            dimension_semantics=("parallel", "arbitrary"),
        ),
    )(pr2d, gt2d)

    # Final (tiny) cross-lane reduction + dice formula in plain JAX, so the
    # caller-supplied eps/beta are honored.
    sums = partials.reshape(nsplit, 3, SUBLANES, LANES).sum(axis=(0, 2, 3))
    tp = sums[0]
    fp = sums[1] - tp
    fn = sums[2] - tp
    beta2 = beta * beta
    score = ((1.0 + beta2) * tp + eps) / ((1.0 + beta2) * tp + beta2 * fn + fp + eps)
    return (1.0 - score).astype(jnp.float32)


def _reference_dice_loss(y_pr, y_gt, eps=1e-07):
    pr = jax.nn.sigmoid(y_pr.astype(jnp.float32))
    gt = y_gt.astype(jnp.float32)
    tp = jnp.sum(gt * pr)
    fp = jnp.sum(pr) - tp
    fn = jnp.sum(gt) - tp
    score = (2.0 * tp + eps) / (2.0 * tp + fn + fp + eps)
    return 1.0 - score


if __name__ == "__main__":
    key = jax.random.PRNGKey(0)
    k1, k2, k3, k4 = jax.random.split(key, 4)

    # Case 1: NCHW logits + binary mask, size divisible by 128 (no-mask path).
    shape1 = (2, 4, 16, 16)
    y_pr1 = jax.random.normal(k1, shape1, dtype=jnp.float32)             # logits
    y_gt1 = (jax.random.uniform(k2, shape1) > 0.5).astype(jnp.float32)   # mask
    loss1 = jax.block_until_ready(dice_loss(y_pr1, y_gt1))
    ref1 = _reference_dice_loss(y_pr1, y_gt1)
    assert jnp.allclose(loss1, ref1, rtol=1e-5, atol=1e-6), (loss1, ref1)

    # Case 2: ragged size + bf16 inputs (exercises in-kernel tail mask and
    # native-dtype streaming with in-kernel cast).
    shape2 = (2, 3, 17, 23)
    y_pr2 = jax.random.normal(k3, shape2, dtype=jnp.bfloat16)
    y_gt2 = (jax.random.uniform(k4, shape2) > 0.5).astype(jnp.bfloat16)
    loss2 = jax.block_until_ready(dice_loss(y_pr2, y_gt2))
    ref2 = _reference_dice_loss(y_pr2, y_gt2)
    assert jnp.allclose(loss2, ref2, rtol=1e-4, atol=1e-5), (loss2, ref2)

    print("KERNEL_OK")
</pallas_src>

<mosaic_0001>
module attributes {stable_mosaic.version = 11 : i64} {
  func.func @kernel(%arg0: i32, %arg1: i32, %arg2: memref<16x128xf32, #tpu.memory_space<vmem>>, %arg3: memref<16x128xf32, #tpu.memory_space<vmem>>, %arg4: memref<3x8x128xf32, #tpu.memory_space<vmem>>) attributes {dimension_semantics = [#tpu.dimension_semantics<parallel>, #tpu.dimension_semantics<arbitrary>], iteration_bounds = array<i64: 1, 1>, scalar_prefetch = 0 : i64, scratch_operands = 0 : i64, tpu.core_type = #tpu.core_type<tc>, window_params = [{transform_indices = @transform_0, window_bounds = array<i64: 16, 128>}, {transform_indices = @transform_1, window_bounds = array<i64: 16, 128>}, {transform_indices = @transform_2, window_bounds = array<i64: 3, 8, 128>}]} {
    %c0_i32 = arith.constant 0 : i32
    %0 = arith.cmpi eq, %arg1, %c0_i32 : i32
    %1 = arith.extui %0 : i1 to i32
    %c0_i32_0 = arith.constant 0 : i32
    %2 = arith.cmpi ne, %1, %c0_i32_0 : i32
    scf.if %2 {
      %cst_23 = arith.constant 0.000000e+00 : f32
      %35 = vector.broadcast %cst_23 : f32 to vector<3x8x128xf32>
      %c0_24 = arith.constant 0 : index
      %c0_25 = arith.constant 0 : index
      %c0_26 = arith.constant 0 : index
      %36 = vector.load %arg4[%c0_24, %c0_25, %c0_26] : memref<3x8x128xf32, #tpu.memory_space<vmem>>, vector<3x8x128xf32>
      tpu.vector_store %arg4[%c0_24, %c0_25, %c0_26], %35 {strides = array<i32>} : memref<3x8x128xf32, #tpu.memory_space<vmem>>, vector<3x8x128xf32>,
    } else {
    }
    %c0 = arith.constant 0 : index
    %c0_1 = arith.constant 0 : index
    %3 = vector.load %arg2[%c0, %c0_1] : memref<16x128xf32, #tpu.memory_space<vmem>>, vector<16x128xf32>
    %4 = arith.negf %3 : vector<16x128xf32>
    %5 = math.exp %4 : vector<16x128xf32>
    %cst = arith.constant 1.000000e+00 : f32
    %6 = vector.broadcast %cst : f32 to vector<16x128xf32>
    %7 = arith.addf %6, %5 : vector<16x128xf32>
    %8 = arith.divf %6, %7 : vector<16x128xf32>
    %c0_2 = arith.constant 0 : index
    %c0_3 = arith.constant 0 : index
    %9 = vector.load %arg3[%c0_2, %c0_3] : memref<16x128xf32, #tpu.memory_space<vmem>>, vector<16x128xf32>
    %10 = arith.mulf %9, %8 : vector<16x128xf32>
    %c0_4 = arith.constant 0 : index
    %c0_5 = arith.constant 0 : index
    %c0_6 = arith.constant 0 : index
    %11 = vector.load %arg4[%c0_4, %c0_5, %c0_6] : memref<3x8x128xf32, #tpu.memory_space<vmem>>, vector<1x8x128xf32>
    %12 = vector.shape_cast %11 : vector<1x8x128xf32> to vector<8x128xf32>
    %13 = vector.shape_cast %10 : vector<16x128xf32> to vector<2x8x128xf32>
    %cst_7 = arith.constant dense<0.000000e+00> : vector<8x128xf32>
    %14 = vector.multi_reduction <add>, %13, %cst_7 [0] : vector<2x8x128xf32> to vector<8x128xf32>
    %15 = arith.addf %12, %14 : vector<8x128xf32>
    %c0_8 = arith.constant 0 : index
    %c0_9 = arith.constant 0 : index
    %c0_10 = arith.constant 0 : index
    %16 = vector.load %arg4[%c0_8, %c0_9, %c0_10] : memref<3x8x128xf32, #tpu.memory_space<vmem>>, vector<1x8x128xf32>
    %17 = vector.shape_cast %16 : vector<1x8x128xf32> to vector<8x128xf32>
    %18 = vector.shape_cast %15 : vector<8x128xf32> to vector<1x8x128xf32>
    tpu.vector_store %arg4[%c0_8, %c0_9, %c0_10], %18 {strides = array<i32>} : memref<3x8x128xf32, #tpu.memory_space<vmem>>, vector<1x8x128xf32>,
    %c1 = arith.constant 1 : index
    %c0_11 = arith.constant 0 : index
    %c0_12 = arith.constant 0 : index
    %19 = vector.load %arg4[%c1, %c0_11, %c0_12] : memref<3x8x128xf32, #tpu.memory_space<vmem>>, vector<1x8x128xf32>
    %20 = vector.shape_cast %19 : vector<1x8x128xf32> to vector<8x128xf32>
    %21 = vector.shape_cast %8 : vector<16x128xf32> to vector<2x8x128xf32>
    %cst_13 = arith.constant dense<0.000000e+00> : vector<8x128xf32>
    %22 = vector.multi_reduction <add>, %21, %cst_13 [0] : vector<2x8x128xf32> to vector<8x128xf32>
    %23 = arith.addf %20, %22 : vector<8x128xf32>
    %c1_14 = arith.constant 1 : index
    %c0_15 = arith.constant 0 : index
    %c0_16 = arith.constant 0 : index
    %24 = vector.load %arg4[%c1_14, %c0_15, %c0_16] : memref<3x8x128xf32, #tpu.memory_space<vmem>>, vector<1x8x128xf32>
    %25 = vector.shape_cast %24 : vector<1x8x128xf32> to vector<8x128xf32>
    %26 = vector.shape_cast %23 : vector<8x128xf32> to vector<1x8x128xf32>
    tpu.vector_store %arg4[%c1_14, %c0_15, %c0_16], %26 {strides = array<i32>} : memref<3x8x128xf32, #tpu.memory_space<vmem>>, vector<1x8x128xf32>,
    %c2 = arith.constant 2 : index
    %c0_17 = arith.constant 0 : index
    %c0_18 = arith.constant 0 : index
    %27 = vector.load %arg4[%c2, %c0_17, %c0_18] : memref<3x8x128xf32, #tpu.memory_space<vmem>>, vector<1x8x128xf32>
    %28 = vector.shape_cast %27 : vector<1x8x128xf32> to vector<8x128xf32>
    %29 = vector.shape_cast %9 : vector<16x128xf32> to vector<2x8x128xf32>
    %cst_19 = arith.constant dense<0.000000e+00> : vector<8x128xf32>
    %30 = vector.multi_reduction <add>, %29, %cst_19 [0] : vector<2x8x128xf32> to vector<8x128xf32>
    %31 = arith.addf %28, %30 : vector<8x128xf32>
    %c2_20 = arith.constant 2 : index
    %c0_21 = arith.constant 0 : index
    %c0_22 = arith.constant 0 : index
    %32 = vector.load %arg4[%c2_20, %c0_21, %c0_22] : memref<3x8x128xf32, #tpu.memory_space<vmem>>, vector<1x8x128xf32>
    %33 = vector.shape_cast %32 : vector<1x8x128xf32> to vector<8x128xf32>
    %34 = vector.shape_cast %31 : vector<8x128xf32> to vector<1x8x128xf32>
    tpu.vector_store %arg4[%c2_20, %c0_21, %c0_22], %34 {strides = array<i32>} : memref<3x8x128xf32, #tpu.memory_space<vmem>>, vector<1x8x128xf32>,
    return
  }
  func.func @transform_0(%arg0: i32, %arg1: i32) -> (i32, i32) {
    %c1_i32 = arith.constant 1 : i32
    %0 = arith.muli %arg0, %c1_i32 : i32
    %1 = arith.addi %0, %arg1 : i32
    %c0_i32 = arith.constant 0 : i32
    %c0_i32_0 = arith.constant 0 : i32
    return %1, %c0_i32 : i32, i32
  }
  func.func @transform_1(%arg0: i32, %arg1: i32) -> (i32, i32) {
    %c1_i32 = arith.constant 1 : i32
    %0 = arith.muli %arg0, %c1_i32 : i32
    %1 = arith.addi %0, %arg1 : i32
    %c0_i32 = arith.constant 0 : i32
    %c0_i32_0 = arith.constant 0 : i32
    return %1, %c0_i32 : i32, i32
  }
  func.func @transform_2(%arg0: i32, %arg1: i32) -> (i32, i32, i32) {
    %c0_i32 = arith.constant 0 : i32
    %c0_i32_0 = arith.constant 0 : i32
    %c0_i32_1 = arith.constant 0 : i32
    return %arg0, %c0_i32, %c0_i32_0 : i32, i32, i32
  }
}

</mosaic_0001>

<bundles_post_ra>
// kernel: tpu_custom_call.1
= control target key start
LH: loop header
LB: loop body
LE: loop exit
PB: predicated region body
PF: predicated region fallthrough
CT: control target
= control target key end

     0   :  { %7 = vsyncpa [#allocation3], 0  ;;  %s229_s0 = inlined_call_operand.hbm [shape: f32[16,128], index: 0, kind: input, shape index: {}]   ;;  %s230_s1 = inlined_call_operand.hbm [shape: f32[16,128], index: 1, kind: input, shape index: {}]   ;;  %s231_s2 = inlined_call_operand.hbm [shape: f32[3,8,128], index: 2, kind: output, shape index: {}]  }
   0x1   :  { %8 = vsyncpa [#allocation6], 0 }
   0x2   :  { %9 = vsyncpa [#allocation4], 0  ;;  %s191_s9 = smov [#allocation2]  }
   0x3   :  { %s19_s10 = sshll.u32 %s191_s9, 4  ;;  %s20_s10 = int_to_ptr.vmem [resolvable:$true] %s19_s10 }
   0x4   :  { %s133_s11 = scalar_lea.vmem %s20_s10, 256  ;;  %p138_p1 = scmp.lt.s32.totalorder %s20_s10, %s20_s10 }
   0x5   :  { %p134_p0 = scmp.ne.s32.totalorder %s20_s10, %s133_s11  ;;  %p139_p2 = scmp.lt.s32.totalorder %s133_s11, %s133_s11 }
   0x7   :  { %p140_p3 = por %p139_p2, %p138_p1 }
   0x9   :  { %p141_p4 = pnand %p140_p3, %p134_p0 }
   0xb   :  { %144 = shalt.err (!%p141_p4)
}
   0xc   :  { %s192_s12 = smov 128   ;;  %s193_s13 = smov 8  }
   0xd   :  { %25 = dma.hbm_to_vmem [thread:$0]  %s229_s0, 256, %s20_s10, [#allocation3], %s192_s12, %s192_s12, %s193_s13  }
   0xe   :  { %s194_s16 = smov [#allocation5]  }
   0xf   :  { %s35_s17 = sshll.u32 %s194_s16, 4  ;;  %s36_s17 = int_to_ptr.vmem [resolvable:$true] %s35_s17 }
  0x10   :  { %s153_s18 = scalar_lea.vmem %s36_s17, 256  ;;  %p158_p6 = scmp.lt.s32.totalorder %s36_s17, %s36_s17 }
  0x11   :  { %p154_p5 = scmp.ne.s32.totalorder %s36_s17, %s153_s18  ;;  %p159_p7 = scmp.lt.s32.totalorder %s153_s18, %s153_s18 }
  0x13   :  { %p160_p8 = por %p159_p7, %p158_p6 }
  0x15   :  { %p161_p9 = pnand %p160_p8, %p154_p5 }
  0x17   :  { %164 = shalt.err (!%p161_p9)
}
  0x18   :  { %41 = dma.hbm_to_vmem [thread:$0]  %s230_s1, 256, %s36_s17, [#allocation6], %s192_s12, %s192_s12, %s193_s13  }
  0x19   :  { %185 = dma.done.wait [#allocation3], 256  }
  0x1a   :  { %186 = vsyncadd [#allocation3], 4294967040 }
  0x1b   :  { %187 = dma.done.wait [#allocation6], 256  }
  0x1c   :  { %188 = vsyncadd [#allocation6], 4294967040  ;;  %v59_v0 = vld [vmem:[#allocation2] sm:$0xff]  ;;  %v60_v1 = vld [vmem:[#allocation2 + $0x8] sm:$0xff]  ;;  %s195_s0 = smov [#allocation7]  }
  0x1d   :  { %v109_v2 = vmul.f32 -1.442695, %v59_v0  ;;  %v110_v3 = vmul.f32 -1.442695, %v60_v1  ;;  %v73_v4 = vld [vmem:[#allocation5] sm:$0xff]  ;;  %v74_v5 = vld [vmem:[#allocation5 + $0x8] sm:$0xff] }
  0x1e   :  { %v88_v6 = vadd.f32 %v74_v5, %v73_v4  ;;  %s96_s1 = sshll.u32 %s195_s0, 4  ;;  %s97_s1 = int_to_ptr.vmem [resolvable:$true] %s96_s1 }
  0x1f   :  { %117 = vpow2.f32 %v109_v2  ;;  %s165_s21 = scalar_lea.vmem %s97_s1, 384  ;;  %p170_p11 = scmp.lt.s32.totalorder %s97_s1, %s97_s1 }
  0x20   :  { %119 = vpow2.f32 %v110_v3  ;;  %90 = vst [vmem:[#allocation7 + $0x10] sm:$0xff] %v88_v6  ;;  %p166_p10 = scmp.ne.s32.totalorder %s97_s1, %s165_s21  ;;  %p171_p12 = scmp.lt.s32.totalorder %s165_s21, %s165_s21 }
  0x22   :  { %p172_p13 = por %p171_p12, %p170_p11 }
  0x24   :  { %p173_p0 = pnand %p172_p13, %p166_p10 }
  0x2c   :  { %v118_v7 = vpop.eup %117 }
  0x2d   :  { %v120_v8 = vpop.eup %119  ;;  %v67_v9 = vadd.f32 1.0, %v118_v7 }
  0x2e   :  { %v68_v10 = vadd.f32 1.0, %v120_v8 }
  0x2f   :  { %121 = vrcp.f32 %v67_v9 }
  0x30   :  { %123 = vrcp.f32 %v68_v10 }
  0x3c   :  { %v122_v11 = vpop.eup %121 }
  0x3d   :  { %v124_v12 = vpop.eup %123  ;;  %v75_v13 = vmul.f32 %v122_v11, %v73_v4 }
  0x3e   :  { %v76_v14 = vmul.f32 %v124_v12, %v74_v5  ;;  %v83_v15 = vadd.f32 %v124_v12, %v122_v11 }
  0x40   :  { %v78_v16 = vadd.f32 %v76_v14, %v75_v13  ;;  %85 = vst [vmem:[#allocation7 + $0x8] sm:$0xff] %v83_v15 }
  0x42   :  { %80 = vst [vmem:[#allocation7] sm:$0xff] %v78_v16 }
  0x43   :  { %176 = shalt.err (!%p173_p0)
}
  0x44   :  { %102 = dma.vmem_to_hbm [thread:$0]  %s97_s1, 384, %s231_s2, [#allocation4], %s192_s12, %s192_s12, %s193_s13  }
  0x45   :  { %189 = dma.done.wait [#allocation4], 384  }
  0x46   :  { %190 = vsyncadd [#allocation4], 4294966912 }
  0x47   :  { %106 = vsyncpa [#allocation3], 1 }
  0x48   :  { %107 = vsyncpa [#allocation6], 1 }
  0x49   :  { %108 = vsyncpa [#allocation4], 1 }

</bundles_post_ra>
